<compile_context>
chip_gen: v6e
topology: v6e:2x2x1
jax: 0.10.0
libtpu: 0.0.40
codegen_flags: <defaults>
</compile_context>

<pallas_src>
import functools

import jax
import jax.numpy as jnp
from jax.experimental import pallas as pl
from jax.experimental.pallas import tpu as pltpu


# ----------------------------- Pallas kernel --------------------------------

def mixed_conv_kernel(x_ref, w_ref, colmask_ref, g3_ref, g1_ref, bias_ref,
                      o_ref, patch_ref, *, height, width):
    """One grid step == one block of images (the whole batch at this size).

    x_ref       : VMEM (BC, L)       f32  raw images; rows = b*C + c, lanes = h*W + w
    w_ref       : VMEM (2*BC, 9*BC)  bf16 packed conv weights (3x3 rows then 1x1 rows),
                                          block-diagonal over the images of the block
    colmask_ref : VMEM (2, L)        f32  row 0 kills source col W-1 (dw = -1 taps),
                                          row 1 kills source col 0   (dw = +1 taps)
    g3_ref      : VMEM (BC, 1)       f32  Gumbel weight of the 3x3 op, per output row
    g1_ref      : VMEM (BC, 1)       f32  Gumbel weight of the 1x1 op, per output row
    bias_ref    : VMEM (BC, 1)       f32  Gumbel-mixed bias per output row
    o_ref       : VMEM (BC, L)       f32  mixed output (dense (8, 256) store)
    patch_ref   : VMEM (9*BC, L)     f32  scratch patch matrix, rows k*BC + (b*C + c)
    """
    l_out = height * width
    bc = x_ref.shape[0]
    margin = width + 1                            # >= max |tap shift| = W + 1

    x = x_ref[...]                                # (BC, L) f32, read once from HBM
    m_left = colmask_ref[0:1, :]                  # valid source cols for dw = -1 taps
    m_right = colmask_ref[1:2, :]                 # valid source cols for dw = +1 taps

    # Zero padding built in VMEM/vregs (never materialized in HBM): the zero
    # margins handle out-of-image ROWS, the column masks handle the row-major
    # wrap-around of out-of-image COLUMNS.
    zpad = jnp.zeros((bc, margin), x.dtype)
    xm = {
        -1: jnp.concatenate([zpad, x * m_left, zpad], axis=1),
        0: jnp.concatenate([zpad, x, zpad], axis=1),
        1: jnp.concatenate([zpad, x * m_right, zpad], axis=1),
    }

    # Patch matrix: for tap k = (kh, kw), rows [k*BC, (k+1)*BC) hold every
    # (image, channel) row shifted by (kh-1, kw-1) with zero padding.
    for k in range(9):
        dh, dw = k // 3 - 1, k % 3 - 1
        s = dh * width + dw
        piece = x if s == 0 else xm[dw][:, margin + s: margin + s + l_out]
        patch_ref[k * bc:(k + 1) * bc, :] = piece

    # Single MXU matmul producing the UN-mixed per-op results:
    #   rows [0, BC)    = 3x3 conv outputs for every (image, channel)
    #   rows [BC, 2*BC) = 1x1 conv outputs for every (image, channel)
    acc = jnp.dot(w_ref[...], patch_ref[...].astype(jnp.bfloat16),
                  preferred_element_type=jnp.float32)          # (2*BC, L) f32

    # Gumbel mixing + bias once, in f32, on the VPU (scales never touch bf16).
    o_ref[...] = (g3_ref[...] * acc[:bc, :]
                  + g1_ref[...] * acc[bc:, :]
                  + bias_ref[...])


def mixed_module_pallas(x_flat, w_big, colmask, g3, g1, bias, *,
                        batch_block, channels, height, width):
    bc_total, l_out = x_flat.shape
    bc = batch_block * channels
    n_blocks = bc_total // bc
    kernel = functools.partial(mixed_conv_kernel, height=height, width=width)
    return pl.pallas_call(
        kernel,
        out_shape=jax.ShapeDtypeStruct((bc_total, l_out), jnp.float32),
        grid_spec=pltpu.PrefetchScalarGridSpec(
            num_scalar_prefetch=0,
            grid=(n_blocks,),                      # whole batch in one step here
            in_specs=[
                pl.BlockSpec((bc, l_out), lambda i: (i, 0)),        # activations
                # constant operands: DMA'd once (could also be Buffered(1))
                pl.BlockSpec((2 * bc, 9 * bc), lambda i: (0, 0)),   # packed weights
                pl.BlockSpec((2, l_out), lambda i: (0, 0)),         # column masks
                pl.BlockSpec((bc, 1), lambda i: (i, 0)),            # g3 per row
                pl.BlockSpec((bc, 1), lambda i: (i, 0)),            # g1 per row
                pl.BlockSpec((bc, 1), lambda i: (i, 0)),            # mixed bias
            ],
            out_specs=pl.BlockSpec((bc, l_out), lambda i: (i, 0)),
            scratch_shapes=[pltpu.VMEM((9 * bc, l_out), jnp.float32)],
        ),
        # Batch-block axis kept "parallel": v7x's 2 TensorCores each take
        # blocks once n_blocks > 1; at B=2, C=4, 16x16 one step is cheapest.
        compiler_params=pltpu.CompilerParams(
            dimension_semantics=("parallel",)),
    )(x_flat, w_big, colmask, g3, g1, bias)


# ------------------------------ glue / wrapper -------------------------------

def gumbel_softmax_sample(key, logits, temperature, axis=0):
    u = jax.random.uniform(key, logits.shape, minval=1e-6, maxval=1.0 - 1e-6)
    g = -jnp.log(-jnp.log(u))
    return jax.nn.softmax((logits + g) / temperature, axis=axis)


def super_network_forward(params, x_nchw, key):
    """Returns (output NCHW, cost (B,)) like SuperNetwork.forward."""
    B, C, H, W = x_nchw.shape
    L = H * W
    tau = params["gumbel_temperature"]
    arch = params["gumble_arch_params"]                        # (n_ops, 1)
    logits = jnp.broadcast_to(arch, (arch.shape[0], B))        # expand(-1, B)
    weights = gumbel_softmax_sample(key, logits, tau, axis=0)  # (n_ops, B)

    BB = B                        # batch block = whole batch -> single grid step
    BC = BB * C

    # Activations: plain reshape; no padded HBM copy, no pre-cast copy.
    x_flat = x_nchw.reshape(B * C, L)

    # Packed MXU weight matrix (2*BC, 9*BC) bf16:
    #   row (3x3, b, co), col (tap k, b', ci) -> w3[co, ci, kh, kw]  if b == b'
    #   row (1x1, b, co), col (tap k, b', ci) -> w1[co, ci]          if b == b', k == 4
    w3_t = jnp.transpose(params["w3x3"], (2, 3, 0, 1)).reshape(9, C, C)  # (k, co, ci)
    eye_b = jnp.eye(BB, dtype=jnp.float32)
    big3 = jnp.einsum("bp,kij->bikpj", eye_b, w3_t).reshape(BC, 9 * BC)
    centre = jnp.zeros((9,), jnp.float32).at[4].set(1.0)
    big1 = jnp.einsum("bp,k,ij->bikpj", eye_b, centre,
                      params["w1x1"]).reshape(BC, 9 * BC)
    w_big = jnp.concatenate([big3, big1], axis=0).astype(jnp.bfloat16)

    # Column masks for the in-kernel zero padding (kill wrapped-around columns).
    col = jnp.arange(L, dtype=jnp.int32) % W
    colmask = jnp.stack([(col != W - 1), (col != 0)], axis=0).astype(jnp.float32)

    # Per-output-row Gumbel scales and pre-mixed bias (stay f32; VPU only).
    g1_col = jnp.repeat(weights[0], C).reshape(B * C, 1)       # 1x1 candidate op
    g3_col = jnp.repeat(weights[1], C).reshape(B * C, 1)       # 3x3 candidate op
    bias_col = (g1_col * jnp.tile(params["b1x1"], B).reshape(B * C, 1)
                + g3_col * jnp.tile(params["b3x3"], B).reshape(B * C, 1))

    out_flat = mixed_module_pallas(x_flat, w_big, colmask, g3_col, g1_col,
                                   bias_col, batch_block=BB, channels=C,
                                   height=H, width=W)          # (B*C, H*W) f32
    out = out_flat.reshape(B, C, H, W)

    # Plain convs contribute no dynamic cost: cost = sum_i w_i * static_cost_i.
    cost = weights.T @ params["ops_cost_static"]               # (B,)
    return out, cost


# pure-JAX reference for sanity checking
def reference_forward(params, x_nchw, key):
    B, C, H, W = x_nchw.shape
    tau = params["gumbel_temperature"]
    arch = params["gumble_arch_params"]
    logits = jnp.broadcast_to(arch, (arch.shape[0], B))
    weights = gumbel_softmax_sample(key, logits, tau, axis=0)

    y1 = jax.lax.conv_general_dilated(
        x_nchw, params["w1x1"][:, :, None, None], (1, 1), "SAME",
        dimension_numbers=("NCHW", "OIHW", "NCHW"))
    y1 = y1 + params["b1x1"][None, :, None, None]
    y3 = jax.lax.conv_general_dilated(
        x_nchw, params["w3x3"], (1, 1), "SAME",
        dimension_numbers=("NCHW", "OIHW", "NCHW"))
    y3 = y3 + params["b3x3"][None, :, None, None]
    out = (weights[0][:, None, None, None] * y1
           + weights[1][:, None, None, None] * y3)
    cost = weights.T @ params["ops_cost_static"]
    return out, cost


# --------------------------------- main --------------------------------------

if __name__ == "__main__":
    B, C, H, W = 2, 4, 16, 16

    key = jax.random.PRNGKey(0)
    k_x, k_w1, k_b1, k_w3, k_b3, k_gumbel = jax.random.split(key, 6)

    x = jax.random.normal(k_x, (B, C, H, W), dtype=jnp.float32)

    params = {
        # MixedModule.__init__: arch params = ones(n_ops, 1), temperature = 1.0
        "gumble_arch_params": jnp.ones((2, 1), dtype=jnp.float32),
        "gumbel_temperature": jnp.float32(1.0),
        # ops_cost_static: deterministic analytic FLOP counts
        # (mimics thop_estimate_flops_as_cost; __init__ default is zeros)
        "ops_cost_static": jnp.array([C * C * H * W, 9 * C * C * H * W],
                                     dtype=jnp.float32),
        # op 0: Conv2d(C, C, 1, bias=True)
        "w1x1": 0.1 * jax.random.normal(k_w1, (C, C), dtype=jnp.float32),
        "b1x1": 0.1 * jax.random.normal(k_b1, (C,), dtype=jnp.float32),
        # op 1: Conv2d(C, C, 3, padding=1, bias=True)
        "w3x3": 0.1 * jax.random.normal(k_w3, (C, C, 3, 3), dtype=jnp.float32),
        "b3x3": 0.1 * jax.random.normal(k_b3, (C,), dtype=jnp.float32),
    }

    out, cost = jax.jit(functools.partial(super_network_forward, params))(
        x, k_gumbel)
    jax.block_until_ready((out, cost))

    ref_out, ref_cost = reference_forward(params, x, k_gumbel)
    assert out.shape == (B, C, H, W) and cost.shape == (B,)
    # MXU operands are bf16 -> relaxed tolerance
    assert jnp.allclose(out, ref_out, atol=5e-2, rtol=5e-2), float(
        jnp.max(jnp.abs(out - ref_out)))
    assert jnp.allclose(cost, ref_cost, atol=1e-3, rtol=1e-5)

    print("KERNEL_OK")
</pallas_src>

<mosaic_0001>
module attributes {stable_mosaic.version = 11 : i64} {
  func.func @mixed_conv_kernel(%arg0: i32, %arg1: memref<8x256xf32, #tpu.memory_space<vmem>>, %arg2: memref<16x72xbf16, #tpu.memory_space<vmem>>, %arg3: memref<2x256xf32, #tpu.memory_space<vmem>>, %arg4: memref<8x1xf32, #tpu.memory_space<vmem>>, %arg5: memref<8x1xf32, #tpu.memory_space<vmem>>, %arg6: memref<8x1xf32, #tpu.memory_space<vmem>>, %arg7: memref<8x256xf32, #tpu.memory_space<vmem>>, %arg8: memref<72x256xf32, #tpu.memory_space<vmem>>) attributes {dimension_semantics = [#tpu.dimension_semantics<parallel>], iteration_bounds = array<i64: 1>, scalar_prefetch = 0 : i64, scratch_operands = 1 : i64, tpu.core_type = #tpu.core_type<tc>, window_params = [{transform_indices = @transform_0, window_bounds = array<i64: 8, 256>}, {pipeline_mode = #tpu.pipeline_mode<synchronous>, transform_indices = @transform_1, window_bounds = array<i64: 16, 72>}, {pipeline_mode = #tpu.pipeline_mode<synchronous>, transform_indices = @transform_2, window_bounds = array<i64: 2, 256>}, {transform_indices = @transform_3, window_bounds = array<i64: 8, 1>}, {transform_indices = @transform_4, window_bounds = array<i64: 8, 1>}, {transform_indices = @transform_5, window_bounds = array<i64: 8, 1>}, {transform_indices = @transform_6, window_bounds = array<i64: 8, 256>}]} {
    %c0 = arith.constant 0 : index
    %c0_0 = arith.constant 0 : index
    %0 = vector.load %arg1[%c0, %c0_0] : memref<8x256xf32, #tpu.memory_space<vmem>>, vector<8x256xf32>
    %c0_1 = arith.constant 0 : index
    %c0_2 = arith.constant 0 : index
    %1 = vector.load %arg3[%c0_1, %c0_2] : memref<2x256xf32, #tpu.memory_space<vmem>>, vector<1x256xf32>
    %c1 = arith.constant 1 : index
    %c0_3 = arith.constant 0 : index
    %2 = vector.load %arg3[%c1, %c0_3] : memref<2x256xf32, #tpu.memory_space<vmem>>, vector<1x256xf32>
    %cst = arith.constant 0.000000e+00 : f32
    %3 = vector.broadcast %cst : f32 to vector<8x17xf32>
    %4 = vector.broadcast %1 : vector<1x256xf32> to vector<8x256xf32>
    %5 = arith.mulf %0, %4 : vector<8x256xf32>
    %6 = tpu.concatenate %3, %5, %3 in 1 : vector<8x17xf32>, vector<8x256xf32>, vector<8x17xf32> -> vector<8x290xf32>
    %7 = tpu.concatenate %3, %0, %3 in 1 : vector<8x17xf32>, vector<8x256xf32>, vector<8x17xf32> -> vector<8x290xf32>
    %8 = vector.broadcast %2 : vector<1x256xf32> to vector<8x256xf32>
    %9 = arith.mulf %0, %8 : vector<8x256xf32>
    %10 = tpu.concatenate %3, %9, %3 in 1 : vector<8x17xf32>, vector<8x256xf32>, vector<8x17xf32> -> vector<8x290xf32>
    %11 = vector.extract_strided_slice %6 {offsets = [0, 0], sizes = [8, 256], strides = [1, 1]} : vector<8x290xf32> to vector<8x256xf32>
    %c0_4 = arith.constant 0 : index
    %c0_5 = arith.constant 0 : index
    %12 = vector.load %arg8[%c0_4, %c0_5] : memref<72x256xf32, #tpu.memory_space<vmem>>, vector<8x256xf32>
    tpu.vector_store %arg8[%c0_4, %c0_5], %11 {strides = array<i32>} : memref<72x256xf32, #tpu.memory_space<vmem>>, vector<8x256xf32>,
    %13 = vector.extract_strided_slice %7 {offsets = [0, 1], sizes = [8, 256], strides = [1, 1]} : vector<8x290xf32> to vector<8x256xf32>
    %c8 = arith.constant 8 : index
    %c0_6 = arith.constant 0 : index
    %14 = vector.load %arg8[%c8, %c0_6] : memref<72x256xf32, #tpu.memory_space<vmem>>, vector<8x256xf32>
    tpu.vector_store %arg8[%c8, %c0_6], %13 {strides = array<i32>} : memref<72x256xf32, #tpu.memory_space<vmem>>, vector<8x256xf32>,
    %15 = vector.extract_strided_slice %10 {offsets = [0, 2], sizes = [8, 256], strides = [1, 1]} : vector<8x290xf32> to vector<8x256xf32>
    %c16 = arith.constant 16 : index
    %c0_7 = arith.constant 0 : index
    %16 = vector.load %arg8[%c16, %c0_7] : memref<72x256xf32, #tpu.memory_space<vmem>>, vector<8x256xf32>
    tpu.vector_store %arg8[%c16, %c0_7], %15 {strides = array<i32>} : memref<72x256xf32, #tpu.memory_space<vmem>>, vector<8x256xf32>,
    %17 = vector.extract_strided_slice %6 {offsets = [0, 16], sizes = [8, 256], strides = [1, 1]} : vector<8x290xf32> to vector<8x256xf32>
    %c24 = arith.constant 24 : index
    %c0_8 = arith.constant 0 : index
    %18 = vector.load %arg8[%c24, %c0_8] : memref<72x256xf32, #tpu.memory_space<vmem>>, vector<8x256xf32>
    tpu.vector_store %arg8[%c24, %c0_8], %17 {strides = array<i32>} : memref<72x256xf32, #tpu.memory_space<vmem>>, vector<8x256xf32>,
    %c32 = arith.constant 32 : index
    %c0_9 = arith.constant 0 : index
    %19 = vector.load %arg8[%c32, %c0_9] : memref<72x256xf32, #tpu.memory_space<vmem>>, vector<8x256xf32>
    tpu.vector_store %arg8[%c32, %c0_9], %0 {strides = array<i32>} : memref<72x256xf32, #tpu.memory_space<vmem>>, vector<8x256xf32>,
    %20 = vector.extract_strided_slice %10 {offsets = [0, 18], sizes = [8, 256], strides = [1, 1]} : vector<8x290xf32> to vector<8x256xf32>
    %c40 = arith.constant 40 : index
    %c0_10 = arith.constant 0 : index
    %21 = vector.load %arg8[%c40, %c0_10] : memref<72x256xf32, #tpu.memory_space<vmem>>, vector<8x256xf32>
    tpu.vector_store %arg8[%c40, %c0_10], %20 {strides = array<i32>} : memref<72x256xf32, #tpu.memory_space<vmem>>, vector<8x256xf32>,
    %22 = vector.extract_strided_slice %6 {offsets = [0, 32], sizes = [8, 256], strides = [1, 1]} : vector<8x290xf32> to vector<8x256xf32>
    %c48 = arith.constant 48 : index
    %c0_11 = arith.constant 0 : index
    %23 = vector.load %arg8[%c48, %c0_11] : memref<72x256xf32, #tpu.memory_space<vmem>>, vector<8x256xf32>
    tpu.vector_store %arg8[%c48, %c0_11], %22 {strides = array<i32>} : memref<72x256xf32, #tpu.memory_space<vmem>>, vector<8x256xf32>,
    %24 = vector.extract_strided_slice %7 {offsets = [0, 33], sizes = [8, 256], strides = [1, 1]} : vector<8x290xf32> to vector<8x256xf32>
    %c56 = arith.constant 56 : index
    %c0_12 = arith.constant 0 : index
    %25 = vector.load %arg8[%c56, %c0_12] : memref<72x256xf32, #tpu.memory_space<vmem>>, vector<8x256xf32>
    tpu.vector_store %arg8[%c56, %c0_12], %24 {strides = array<i32>} : memref<72x256xf32, #tpu.memory_space<vmem>>, vector<8x256xf32>,
    %26 = vector.extract_strided_slice %10 {offsets = [0, 34], sizes = [8, 256], strides = [1, 1]} : vector<8x290xf32> to vector<8x256xf32>
    %c64 = arith.constant 64 : index
    %c0_13 = arith.constant 0 : index
    %27 = vector.load %arg8[%c64, %c0_13] : memref<72x256xf32, #tpu.memory_space<vmem>>, vector<8x256xf32>
    tpu.vector_store %arg8[%c64, %c0_13], %26 {strides = array<i32>} : memref<72x256xf32, #tpu.memory_space<vmem>>, vector<8x256xf32>,
    %c0_14 = arith.constant 0 : index
    %c0_15 = arith.constant 0 : index
    %28 = vector.load %arg2[%c0_14, %c0_15] : memref<16x72xbf16, #tpu.memory_space<vmem>>, vector<16x72xbf16>
    %c0_16 = arith.constant 0 : index
    %c0_17 = arith.constant 0 : index
    %29 = vector.load %arg8[%c0_16, %c0_17] : memref<72x256xf32, #tpu.memory_space<vmem>>, vector<72x256xf32>
    %30 = arith.truncf %29 : vector<72x256xf32> to vector<72x256xbf16>
    %cst_18 = arith.constant dense<0.000000e+00> : vector<16x256xf32>
    %31 = tpu.matmul %28, %30, %cst_18 {dimension_numbers = #tpu.dot_dimension_numbers<[1], [0], [0], [1], [0, 0, 1, 1], [], []>} : vector<16x72xbf16>, vector<72x256xbf16>, vector<16x256xf32> -> vector<16x256xf32>
    %c0_19 = arith.constant 0 : index
    %c0_20 = arith.constant 0 : index
    %32 = vector.load %arg4[%c0_19, %c0_20] : memref<8x1xf32, #tpu.memory_space<vmem>>, vector<8x1xf32>
    %33 = vector.extract_strided_slice %31 {offsets = [0, 0], sizes = [8, 256], strides = [1, 1]} : vector<16x256xf32> to vector<8x256xf32>
    %34 = vector.broadcast %32 : vector<8x1xf32> to vector<8x256xf32>
    %35 = arith.mulf %34, %33 : vector<8x256xf32>
    %c0_21 = arith.constant 0 : index
    %c0_22 = arith.constant 0 : index
    %36 = vector.load %arg5[%c0_21, %c0_22] : memref<8x1xf32, #tpu.memory_space<vmem>>, vector<8x1xf32>
    %37 = vector.extract_strided_slice %31 {offsets = [8, 0], sizes = [8, 256], strides = [1, 1]} : vector<16x256xf32> to vector<8x256xf32>
    %38 = vector.broadcast %36 : vector<8x1xf32> to vector<8x256xf32>
    %39 = arith.mulf %38, %37 : vector<8x256xf32>
    %40 = arith.addf %35, %39 : vector<8x256xf32>
    %c0_23 = arith.constant 0 : index
    %c0_24 = arith.constant 0 : index
    %41 = vector.load %arg6[%c0_23, %c0_24] : memref<8x1xf32, #tpu.memory_space<vmem>>, vector<8x1xf32>
    %42 = vector.broadcast %41 : vector<8x1xf32> to vector<8x256xf32>
    %43 = arith.addf %40, %42 : vector<8x256xf32>
    %c0_25 = arith.constant 0 : index
    %c0_26 = arith.constant 0 : index
    %44 = vector.load %arg7[%c0_25, %c0_26] : memref<8x256xf32, #tpu.memory_space<vmem>>, vector<8x256xf32>
    tpu.vector_store %arg7[%c0_25, %c0_26], %43 {strides = array<i32>} : memref<8x256xf32, #tpu.memory_space<vmem>>, vector<8x256xf32>,
    return
  }
  func.func @transform_0(%arg0: i32) -> (i32, i32) {
    %c0_i32 = arith.constant 0 : i32
    %c0_i32_0 = arith.constant 0 : i32
    return %arg0, %c0_i32 : i32, i32
  }
  func.func @transform_1(%arg0: i32) -> (i32, i32) {
    %c0_i32 = arith.constant 0 : i32
    %c0_i32_0 = arith.constant 0 : i32
    %c0_i32_1 = arith.constant 0 : i32
    return %c0_i32, %c0_i32_0 : i32, i32
  }
  func.func @transform_2(%arg0: i32) -> (i32, i32) {
    %c0_i32 = arith.constant 0 : i32
    %c0_i32_0 = arith.constant 0 : i32
    %c0_i32_1 = arith.constant 0 : i32
    return %c0_i32, %c0_i32_0 : i32, i32
  }
  func.func @transform_3(%arg0: i32) -> (i32, i32) {
    %c0_i32 = arith.constant 0 : i32
    %c0_i32_0 = arith.constant 0 : i32
    return %arg0, %c0_i32 : i32, i32
  }
  func.func @transform_4(%arg0: i32) -> (i32, i32) {
    %c0_i32 = arith.constant 0 : i32
    %c0_i32_0 = arith.constant 0 : i32
    return %arg0, %c0_i32 : i32, i32
  }
  func.func @transform_5(%arg0: i32) -> (i32, i32) {
    %c0_i32 = arith.constant 0 : i32
    %c0_i32_0 = arith.constant 0 : i32
    return %arg0, %c0_i32 : i32, i32
  }
  func.func @transform_6(%arg0: i32) -> (i32, i32) {
    %c0_i32 = arith.constant 0 : i32
    %c0_i32_0 = arith.constant 0 : i32
    return %arg0, %c0_i32 : i32, i32
  }
}

</mosaic_0001>

<bundles_post_ra>
// kernel: tile.10
= control target key start
LH: loop header
LB: loop body
LE: loop exit
PB: predicated region body
PF: predicated region fallthrough
CT: control target
= control target key end

     0   :  { %s22_s0 = inlined_call_operand.vmem [shape: f32[4], index: 0, kind: input, shape index: {}]   ;;  %s23_s1 = inlined_call_operand.vmem [shape: f32[2,4], index: 1, kind: output, shape index: {}]  }
   0x1   :  { %v4_v0 = vld [vmem:[%s22_s0] ss:$0 sm:$0xff] }
   0x2   :  { %5 = vst [vmem:[%s23_s1] sm:$0x3] %v4_v0 }

// kernel: super_network_forward.1
= control target key start
LH: loop header
LB: loop body
LE: loop exit
PB: predicated region body
PF: predicated region fallthrough
CT: control target
= control target key end

     0   :  { %v30_v0 = vlaneseq  ;;  %s383_s29 = smov 17   ;;  %vm48_vm0 = vcmask 138240   ;;  %s386_s30 = smov 96   ;;  %v391_v41 = vmov 0   ;;  %vm184_vm1 = vcmask 769024   ;;  %s489_s0 = inlined_call_operand.vmem [shape: f32[8,256], index: 0, kind: input, shape index: {}]   ;;  %s490_s2 = inlined_call_operand.vmem [shape: f32[2,256], index: 2, kind: input, shape index: {}]   ;;  %s491_s1 = inlined_call_operand.vmem [shape: bf16[16,72], index: 1, kind: input, shape index: {}]   ;;  %s492_s4 = inlined_call_operand.vmem [shape: f32[8,1], index: 4, kind: input, shape index: {}]   ;;  %s493_s3 = inlined_call_operand.vmem [shape: f32[8,1], index: 3, kind: input, shape index: {}]   ;;  %s494_s5 = inlined_call_operand.vmem [shape: f32[8,1], index: 5, kind: input, shape index: {}]   ;;  %s495_s6 = inlined_call_operand.vmem [shape: f32[8,256], index: 6, kind: output, shape index: {}]  }
   0x1   :  { %v431_v1 = vld [vmem:[%s489_s0] sm:$0xff]  ;;  %v436_v2 = vld [vmem:[%s489_s0 + $0x8] sm:$0xff]  ;;  %s384_s0 = smov 95   ;;  %s387_s7 = smov 110   ;;  %269 = vmatprep.mubr.bf16.mxu0 %v391_v41  ;;  %380 = vset.pattern.permute.xlu1 %v391_v41  ;;  %vm230_vm2 = vcmask 1043456   ;;  %vm171_vm3 = vcmask 777216   ;;  %vm316_vm9 = vmneg %vm48_vm0 }
   0x2   :  { %v340_v3 = vpack.i.bf16 %v436_v2, %v431_v1  ;;  %v31_v4 = vshrl.u32 %v30_v0, 7  ;;  %v26_v5 = vld [vmem:[%s490_s2] ss:$2 sm:$0x3]  ;;  %s388_s8 = smov 112   ;;  %s389_s9 = smov 126   ;;  %381 = vset.pattern.permute.xlu0 %v391_v41 }
   0x3   :  { %v312_v6 = vld [vmem:[%s490_s2 + $0x1] ss:$2 sm:$0x3]  ;;  %s385_s2 = smov 94   ;;  %s390_s10 = smov 127   ;;  %vm158_vm4 = vcmask 785408  }
   0x4   :  { %341 = vrot.lane.b32.xlu1 %v340_v3, %s383_s29  ;;  %v32_v7 = vsub.s32 0, %v31_v4  ;;  %v36_v8 = vsub.s32 1, %v31_v4  ;;  %v288_v42 = vld [vmem:[%s492_s4] sm:$0xff]  ;;  %vm145_vm5 = vcmask 900096   ;;  %vm130_vm6 = vcmask 916480  }
   0x5   :  { %v280_v43 = vld [vmem:[%s493_s3] sm:$0xff]  ;;  %vm115_vm7 = vcmask 1031168   ;;  %vm100_vm8 = vcmask 1039360   ;;  %vm392_vm10 = vmmov 1   ;;  %vm226_vm12 = vcmask 588800  }
   0x6   :  { %v70_v9 = vrot.slane %v312_v6, %v32_v7  ;;  %v74_v10 = vrot.slane %v312_v6, %v36_v8  ;;  %v33_v11 = vrot.slane %v26_v5, %v32_v7  ;;  %v37_v12 = vrot.slane %v26_v5, %v36_v8  ;;  %v298_v44 = vld [vmem:[%s494_s5] sm:$0xff]  ;;  %vm317_vm11 = vmpackc.low %vm392_vm10, %vm316_vm9 }
   0x8   :  { %v77_v13 = vmul.f32 %v70_v9, %v431_v1  ;;  %v78_v14 = vmul.f32 %v74_v10, %v436_v2  ;;  %v40_v15 = vmul.f32 %v33_v11, %v431_v1  ;;  %v41_v16 = vmul.f32 %v37_v12, %v436_v2 }
   0xa   :  { %v330_v17 = vpack.i.bf16 %v78_v14, %v77_v13  ;;  %v335_v18 = vpack.i.bf16 %v41_v16, %v40_v15 }
   0xc   :  { %331 = vrot.lane.b32.xlu0 %v330_v17, %s383_s29 }
  0x10   :  { %336 = vrot.lane.b32.xlu0 %v335_v18, %s383_s29 }
  0x76   :  { %v342_v19 = vpop.permute.xlu1 %341 }
  0x77   :  { %v344_v20 = vunpack.i.h.bf16 %v342_v19  ;;  %v343_v21 = vunpack.i.l.bf16 %v342_v19 }
  0x79   :  { %v65_v22 = vsel %vm48_vm0, %v344_v20, 0.0  ;;  %v61_v23 = vsel %vm48_vm0, %v343_v21, %v344_v20  ;;  %v64_v35 = vsel %vm48_vm0, 0.0, %v343_v21 }
  0x7a   :  { %v345_v24 = vpack.i.bf16 %v65_v22, %v61_v23 }
  0x7c   :  { %346 = vrot.lane.b32.xlu0 %v345_v24, %s384_s0 }
  0x7e   :  { %v332_v25 = vpop.permute.xlu0 %331 }
  0x7f   :  { %v334_v26 = vunpack.i.h.bf16 %v332_v25  ;;  %v333_v27 = vunpack.i.l.bf16 %v332_v25 }
  0x81   :  { %v88_v28 = vsel %vm48_vm0, 0.0, %v333_v27  ;;  %v89_v29 = vsel %vm48_vm0, %v334_v26, 0.0  ;;  %v85_v30 = vsel %vm48_vm0, %v333_v27, %v334_v26 }
  0x82   :  { %182 = vrot.lane.b32.xlu0 %v89_v29, %s385_s2  ;;  %v337_v31 = vpop.permute.xlu0 %336  ;;  %v350_v32 = vpack.i.bf16 %v85_v30, %v88_v28  ;;  %v360_v40 = vpack.i.bf16 %v89_v29, %v85_v30 }
  0x83   :  { %v339_v33 = vunpack.i.h.bf16 %v337_v31  ;;  %v455_v34 = vunpack.i.l.bf16 %v337_v31 }
  0x84   :  { %351 = vrot.lane.b32.xlu1 %v350_v32, %s385_s2 }
  0x85   :  { %v54_v36 = vsel %vm48_vm0, %v339_v33, 0.0  ;;  %v461_v37 = vsel %vm48_vm0, %v455_v34, %v339_v33  ;;  %v53_v39 = vsel %vm48_vm0, 0.0, %v455_v34 }
  0x86   :  { %165 = vrot.lane.b32.xlu0 %v64_v35, %s384_s0  ;;  %v355_v38 = vpack.i.bf16 %v54_v36, %v461_v37 }
  0x88   :  { %356 = vrot.lane.b32.xlu1 %v355_v38, %s386_s30 }
  0x8a   :  { %139 = vrot.lane.b32.xlu0 %v88_v28, %s387_s7 }
  0x8c   :  { %152 = vrot.lane.b32.xlu1 %v53_v39, %s386_s30 }
  0x8e   :  { %371 = vrot.lane.b32.xlu0 %v355_v38, %s388_s8 }
  0x90   :  { %361 = vrot.lane.b32.xlu1 %v360_v40, %s387_s7 }
  0x92   :  { %124 = vrot.lane.b32.xlu0 %v53_v39, %s388_s8 }
  0x94   :  { %366 = vrot.lane.b32.xlu1 %v360_v40, %s389_s9 }
  0x96   :  { %94 = vrot.lane.b32.xlu0 %v64_v35, %s390_s10  ;;  %v382_v35 = vld [vmem:[%s491_s1] sm:$0xff]  }
  0x98   :  { %109 = vrot.lane.b32.xlu1 %v88_v28, %s389_s9 }
  0x9a   :  { %291 = vperm.xlu0 %381, %v288_v42  }
  0x9c   :  { %376 = vrot.lane.b32.xlu1 %v345_v24, %s390_s10 }
  0xa0   :  { %283 = vperm.xlu1 %380, %v280_v43  }
  0xa4   :  { %301 = vperm.xlu1 %380, %v298_v44  }
  0xee   :  { %v347_v45 = vpop.permute.xlu0 %346 }
  0xef   :  { %v349_v48 = vunpack.i.h.bf16 %v347_v45  ;;  %v348_v52 = vunpack.i.l.bf16 %v347_v45 }
  0xf1   :  { %v173_v60 = vsel %vm171_vm3, %v348_v52, %v349_v48 }
  0xf4   :  { %v183_v46 = vpop.permute.xlu0 %182 }
  0xf6   :  { %v352_v47 = vpop.permute.xlu1 %351 }
  0xf7   :  { %v354_v49 = vunpack.i.h.bf16 %v352_v47  ;;  %v353_v50 = vunpack.i.l.bf16 %v352_v47 }
  0xf8   :  { %v166_v51 = vpop.permute.xlu0 %165 }
  0xf9   :  { %v186_v53 = vsel %vm184_vm1, %v354_v49, %v183_v46  ;;  %v185_v54 = vsel %vm184_vm1, %v353_v50, %v354_v49  ;;  %v172_v4 = vsel %vm171_vm3, %v166_v51, %v348_v52 }
  0xfa   :  { %v357_v55 = vpop.permute.xlu1 %356  ;;  %v220_v56 = vpack.c.bf16 %v186_v53, %v186_v53  ;;  %v219_v57 = vpack.c.bf16 %v185_v54, %v185_v54 }
  0xfb   :  { %v359_v58 = vunpack.i.h.bf16 %v357_v55  ;;  %v358_v59 = vunpack.i.l.bf16 %v357_v55 }
  0xfc   :  { %314 = vmatprep.subr.msk.bf16.mxu0 %vm230_vm2, %v220_v56  ;;  %v140_v61 = vpop.permute.xlu0 %139  ;;  %v232_v62 = vsel %vm230_vm2, %v219_v57, 0 }
  0xfd   :  { %244 = vmatpush1.bf16.msra.mxu0 %v232_v62  ;;  %v160_v63 = vsel %vm158_vm4, %v358_v59, %v359_v58 }
  0xfe   :  { %v153_v0 = vpop.permute.xlu1 %152  ;;  %v218_v3 = vpack.c.bf16 %v173_v60, %v160_v63 }
  0xff   :  { %v159_v5 = vsel %vm158_vm4, %v153_v0, %v358_v59 }
 0x100   :  { %v217_v6 = vpack.c.bf16 %v172_v4, %v159_v5  ;;  %245 = vmatprep.subr.bf16.mxu0 %v218_v3  ;;  %v372_v7 = vpop.permute.xlu0 %371 }
 0x101   :  { %v374_v11 = vunpack.i.h.bf16 %v372_v7  ;;  %v373_v12 = vunpack.i.l.bf16 %v372_v7 }
 0x102   :  { %v362_v8 = vpop.permute.xlu1 %361  ;;  %246 = vmatpush1.bf16.msra.mxu0 %v217_v6 }
 0x103   :  { %v364_v9 = vunpack.i.h.bf16 %v362_v8  ;;  %v363_v10 = vunpack.i.l.bf16 %v362_v8  ;;  %v132_v22 = vsel %vm130_vm6, %v373_v12, %v374_v11 }
 0x104   :  { %v125_v20 = vpop.permute.xlu0 %124 }
 0x105   :  { %v147_v13 = vsel %vm145_vm5, %v363_v10, %v364_v9  ;;  %v146_v14 = vsel %vm145_vm5, %v140_v61, %v363_v10  ;;  %v131_v25 = vsel %vm130_vm6, %v125_v20, %v373_v12 }
 0x106   :  { %v367_v15 = vpop.permute.xlu1 %366  ;;  %v216_v16 = vpack.c.bf16 %v147_v13, %v436_v2  ;;  %v215_v17 = vpack.c.bf16 %v146_v14, %v431_v1 }
 0x107   :  { %v369_v18 = vunpack.i.h.bf16 %v367_v15  ;;  %v368_v19 = vunpack.i.l.bf16 %v367_v15 }
 0x108   :  { %247 = vmatprep.subr.bf16.mxu0 %v216_v16  ;;  %v95_v1 = vpop.permute.xlu0 %94 }
 0x109   :  { %248 = vmatpush1.bf16.msra.mxu0 %v215_v17  ;;  %v117_v21 = vsel %vm115_vm7, %v368_v19, %v369_v18 }
 0x10a   :  { %v110_v23 = vpop.permute.xlu1 %109  ;;  %v214_v24 = vpack.c.bf16 %v132_v22, %v117_v21 }
 0x10b   :  { %v116_v26 = vsel %vm115_vm7, %v110_v23, %v368_v19 }
 0x10c   :  { %v213_v27 = vpack.c.bf16 %v131_v25, %v116_v26  ;;  %249 = vmatprep.subr.bf16.mxu0 %v214_v24 }
 0x10e   :  { %v377_v28 = vpop.permute.xlu1 %376  ;;  %250 = vmatpush1.bf16.msra.mxu0 %v213_v27 }
 0x10f   :  { %v379_v2 = vunpack.i.h.bf16 %v377_v28  ;;  %v378_v29 = vunpack.i.l.bf16 %v377_v28 }
 0x111   :  { %v101_v30 = vsel %vm100_vm8, %v95_v1, %v378_v29  ;;  %v102_v31 = vsel %vm100_vm8, %v378_v29, %v379_v2 }
 0x112   :  { %v318_v32 = vpack.c.bf16 %v101_v30, %v455_v34  ;;  %v212_v33 = vpack.c.bf16 %v102_v31, %v461_v37 }
 0x114   :  { %251 = vmatprep.subr.bf16.mxu0 %v212_v33 }
 0x115   :  { %319 = vmatpush1.bf16.msk.msra.mxu0 %vm317_vm11, %v318_v32  ;;  %v292_v40 = vpop.permute.xlu0 %291 }
 0x118   :  { %315 = vmatmul.mubr.msk.bf16.vlgmr.msra.gmra.mxu0 %vm226_vm12, %v382_v35 }
 0x11b   :  { %v284_v38 = vpop.permute.xlu1 %283 }
 0x11f   :  { %v302_v46 = vpop.permute.xlu1 %301 }
 0x1d8   :  { %v271_v36 = vpop.f32.mrf.mxu0 }
 0x1d9   :  { %v286_v42 = vmul.f32 %v284_v38, %v271_v36 }
 0x1da   :  { %v273_v39 = vpop.f32.mrf.mxu0 }
 0x1db   :  { %v287_v44 = vmul.f32 %v284_v38, %v273_v39 }
 0x1dc   :  { %v275_v41 = vpop.f32.mrf.mxu0 }
 0x1dd   :  { %v294_v43 = vmul.f32 %v292_v40, %v275_v41 }
 0x1de   :  { %v277_v34 = vpop.f32.mrf.mxu0 }
 0x1df   :  { %v296_v37 = vadd.f32 %v294_v43, %v286_v42  ;;  %v295_v45 = vmul.f32 %v292_v40, %v277_v34 }
 0x1e1   :  { %v304_v47 = vadd.f32 %v302_v46, %v296_v37  ;;  %v297_v48 = vadd.f32 %v295_v45, %v287_v44 }
 0x1e3   :  { %306 = vst [vmem:[%s495_s6] sm:$0xff] %v304_v47  ;;  %v305_v49 = vadd.f32 %v302_v46, %v297_v48 }
 0x1e5   :  { %307 = vst [vmem:[%s495_s6 + $0x8] sm:$0xff] %v305_v49 }

</bundles_post_ra>
